<compile_context>
chip_gen: v5e
topology: v5e:2x2
jax: 0.10.0
libtpu: 0.0.40
codegen_flags: <defaults>
</compile_context>

<pallas_src>
import jax
import jax.numpy as jnp
from jax import lax
from jax.experimental import pallas as pl
from jax.experimental.pallas import tpu as pltpu


# ---------------------------------------------------------------------------
# Kernels
# ---------------------------------------------------------------------------

def _make_vpu_kernel(c_in, c_out, ts, strip):
    """VPU broadcast-FMA path (tiny C_in*C_out).

    w_ref: (C_out, C_in)       SMEM scalars
    b_ref: (C_out,)            SMEM scalars
    x_ref: (1, C_in, TS, 128)  VMEM  (sublane-dense spatial slabs)
    o_ref: (1, C_out, TS, 128) VMEM
    """
    n_strips = ts // strip

    def kernel(w_ref, b_ref, x_ref, o_ref):
        def body(s, carry):
            base = pl.multiple_of(s * strip, strip)
            for co in range(c_out):                       # unrolled at trace time
                # (strip, 128) slab FMA: full vreg occupancy on the VALU.
                acc = x_ref[0, 0, pl.ds(base, strip), :] * w_ref[co, 0]
                for ci in range(1, c_in):
                    acc = acc + x_ref[0, ci, pl.ds(base, strip), :] * w_ref[co, ci]
                # Dense (strip, 128) store — unmasked vst.
                o_ref[0, co, pl.ds(base, strip), :] = (
                    acc + b_ref[co]).astype(o_ref.dtype)
            return carry

        lax.fori_loop(0, n_strips, body, 0)

    return kernel


def _outconv_mxu_kernel(w_ref, b_ref, x_ref, o_ref):
    """MXU path (larger channel counts).

    w_ref: (C_out, C_in)  VMEM (resident)
    b_ref: (C_out, 1)     VMEM (resident)
    x_ref: (1, C_in, TM)  VMEM
    o_ref: (1, C_out, TM) VMEM
    """
    bias = b_ref[...]                                     # hoisted before the dot
    acc = jnp.dot(w_ref[...], x_ref[0], preferred_element_type=jnp.float32)
    o_ref[0] = (acc + bias).astype(o_ref.dtype)


# ---------------------------------------------------------------------------
# Spatial planning
# ---------------------------------------------------------------------------

_VPU_MAX_PRODUCT = 128          # VPU scalar-FMA path only while C_in*C_out is tiny
_TILE_BUDGET = 10 * 1024 * 1024  # dbl-buffered tile bytes; fits all default VMEM limits


def _plan_spatial(hw, c_in, c_out, itemsize, n_batch, resident_bytes, gran):
    """Pick (hw_pad, ts): padded spatial extent and tile size in 128-lane columns.

    Guarantees: hw_pad % 128 == 0; ts divides hw_pad // 128; ts % gran == 0 or
    ts == hw_pad // 128 <= gran (legal full-extent block).
    """
    budget = _TILE_BUDGET - resident_bytes
    per_col = 2 * (c_in + c_out) * 128 * itemsize       # dbl-buffered in+out per column
    max_cols_budget = max(gran, budget // per_col)
    want_blocks = 4                                     # >=2 so both v7x TCs get work

    # Minimal padding: full-extent spatial block when it fits, the batch axis
    # already provides enough grid blocks, and the tile is gran-aligned.
    hw_min = -(-hw // 128) * 128
    s_min = hw_min // 128
    if (s_min <= max_cols_budget
            and (n_batch >= want_blocks or s_min <= gran)
            and (s_min <= gran or s_min % gran == 0)):
        return hw_min, s_min

    # Otherwise tile the spatial axis: pad so gran-column tiles are legal.
    hw_pad = -(-hw // (128 * gran)) * (128 * gran)
    s = hw_pad // 128
    if n_batch >= want_blocks:
        max_cols_grid = s
    else:
        max_cols_grid = max(gran, (s * n_batch) // want_blocks)
    ts = min(s, max_cols_budget, max_cols_grid)
    ts = max(gran, (ts // gran) * gran)
    while s % ts != 0:
        ts -= gran
    return hw_pad, ts


# ---------------------------------------------------------------------------
# Wrapper
# ---------------------------------------------------------------------------

@jax.jit
def out_conv(x, weight, bias):
    """1x1 Conv2d forward (PyTorch OutConv semantics).

    x:      (N, C_in, H, W)
    weight: (C_out, C_in, 1, 1)
    bias:   (C_out,)
    returns (N, C_out, H, W)
    """
    N, C_in, H, W = x.shape
    C_out = weight.shape[0]
    HW = H * W
    itemsize = jnp.dtype(x.dtype).itemsize

    x3d = x.reshape(N, C_in, HW)                        # free reshape, no transpose
    w2d = weight.reshape(C_out, C_in)

    use_vpu = (C_in * C_out) <= _VPU_MAX_PRODUCT

    if use_vpu:
        hw_pad, ts = _plan_spatial(HW, C_in, C_out, itemsize, N,
                                   resident_bytes=0, gran=8)
    else:
        # Resident (double-buffered) VMEM weights/bias come off the budget.
        resident = 2 * (C_out * C_in + C_out) * jnp.dtype(w2d.dtype).itemsize
        hw_pad, ts = _plan_spatial(HW, C_in, C_out, itemsize, N,
                                   resident_bytes=resident, gran=1)

    if hw_pad != HW:
        x3d = jnp.pad(x3d, ((0, 0), (0, 0), (0, hw_pad - HW)))
    s_cols = hw_pad // 128
    grid = (N, s_cols // ts)

    if use_vpu:
        # SMEM requires 32-bit scalars; accumulate in f32.
        w_op = w2d.astype(jnp.float32)
        b_op = bias.astype(jnp.float32)
        x4d = x3d.reshape(N, C_in, s_cols, 128)         # sublane-dense slabs
        strip = 8 if ts % 8 == 0 else ts
        kernel = _make_vpu_kernel(C_in, C_out, ts, strip)
        operands = (w_op, b_op, x4d)
        in_specs = [
            pl.BlockSpec(memory_space=pltpu.MemorySpace.SMEM),
            pl.BlockSpec(memory_space=pltpu.MemorySpec.SMEM) if False else
            pl.BlockSpec(memory_space=pltpu.MemorySpace.SMEM),
            pl.BlockSpec((1, C_in, ts, 128), lambda n, m: (n, 0, m, 0)),
        ]
        out_spec = pl.BlockSpec((1, C_out, ts, 128), lambda n, m: (n, 0, m, 0))
        out_shape = jax.ShapeDtypeStruct((N, C_out, s_cols, 128), x.dtype)
    else:
        tm = ts * 128
        kernel = _outconv_mxu_kernel
        operands = (w2d, bias.reshape(C_out, 1), x3d)
        in_specs = [
            pl.BlockSpec((C_out, C_in), lambda n, m: (0, 0)),
            pl.BlockSpec((C_out, 1), lambda n, m: (0, 0)),
            pl.BlockSpec((1, C_in, tm), lambda n, m: (n, 0, m)),
        ]
        out_spec = pl.BlockSpec((1, C_out, tm), lambda n, m: (n, 0, m))
        out_shape = jax.ShapeDtypeStruct((N, C_out, hw_pad), x.dtype)

    y = pl.pallas_call(
        kernel,
        out_shape=out_shape,
        grid=grid,
        in_specs=in_specs,
        out_specs=out_spec,
        compiler_params=pltpu.CompilerParams(
            dimension_semantics=("parallel", "parallel")),
    )(*operands)

    y = y.reshape(N, C_out, hw_pad)
    if hw_pad != HW:
        y = y[:, :, :HW]
    return y.reshape(N, C_out, H, W)                    # free reshape, no transpose


# ---------------------------------------------------------------------------
# Self-test
# ---------------------------------------------------------------------------

def _reference(x, weight, bias):
    c_out, c_in = weight.shape[0], weight.shape[1]
    return (jnp.einsum("nihw,oi->nohw", x, weight.reshape(c_out, c_in))
            + bias.reshape(1, c_out, 1, 1))


def _make_inputs(key, n, c_in, c_out, h, w):
    k_x, k_w, k_b = jax.random.split(key, 3)
    x = jax.random.normal(k_x, (n, c_in, h, w), dtype=jnp.float32)
    bound = 1.0 / (c_in ** 0.5)                          # nn.Conv2d default init range
    weight = jax.random.uniform(k_w, (c_out, c_in, 1, 1),
                                minval=-bound, maxval=bound, dtype=jnp.float32)
    bias = jax.random.uniform(k_b, (c_out,),
                              minval=-bound, maxval=bound, dtype=jnp.float32)
    return x, weight, bias


if __name__ == "__main__":
    key = jax.random.PRNGKey(0)
    k1, k2 = jax.random.split(key)

    # 1) Tiny-channel case (typical OutConv): exercises the VPU slab path.
    x, weight, bias = _make_inputs(k1, 2, 4, 3, 16, 16)
    y = jax.block_until_ready(out_conv(x, weight, bias))
    y_ref = _reference(x, weight, bias)
    assert y.shape == (2, 3, 16, 16)
    assert jnp.allclose(y, y_ref, atol=1e-4, rtol=1e-4)

    # 2) Larger-channel case: exercises the MXU path.
    x2, weight2, bias2 = _make_inputs(k2, 2, 16, 16, 16, 16)
    y2 = jax.block_until_ready(out_conv(x2, weight2, bias2))
    y2_ref = _reference(x2, weight2, bias2)
    assert y2.shape == (2, 16, 16, 16)
    assert jnp.allclose(y2, y2_ref, atol=1e-4, rtol=1e-4)

    print("KERNEL_OK")
</pallas_src>

<mosaic_0001>
module attributes {stable_mosaic.version = 11 : i64} {
  func.func @kernel(%arg0: i32, %arg1: i32, %arg2: memref<3x4xf32, #tpu.memory_space<smem>>, %arg3: memref<3xf32, #tpu.memory_space<smem>>, %arg4: memref<1x4x2x128xf32, #tpu.memory_space<vmem>>, %arg5: memref<1x3x2x128xf32, #tpu.memory_space<vmem>>) attributes {dimension_semantics = [#tpu.dimension_semantics<parallel>, #tpu.dimension_semantics<parallel>], iteration_bounds = array<i64: 2, 1>, scalar_prefetch = 0 : i64, scratch_operands = 0 : i64, tpu.core_type = #tpu.core_type<tc>, window_params = [{transform_indices = @transform_0, window_bounds = array<i64: 3, 4>}, {transform_indices = @transform_1, window_bounds = array<i64: 3>}, {transform_indices = @transform_2, window_bounds = array<i64: 1, 4, 2, 128>}, {transform_indices = @transform_3, window_bounds = array<i64: 1, 3, 2, 128>}]} {
    %c0_i32 = arith.constant 0 : i32
    %c2_i32 = arith.constant 2 : i32
    %0 = arith.muli %c0_i32, %c2_i32 : i32
    %1 = tpu.assume_multiple %0, 2 : i32
    %c0 = arith.constant 0 : index
    %c0_0 = arith.constant 0 : index
    %2 = arith.index_cast %1 : i32 to index
    %c0_1 = arith.constant 0 : index
    %3 = vector.load %arg4[%c0, %c0_0, %2, %c0_1] : memref<1x4x2x128xf32, #tpu.memory_space<vmem>>, vector<1x1x2x128xf32>
    %4 = vector.shape_cast %3 : vector<1x1x2x128xf32> to vector<2x128xf32>
    %c0_2 = arith.constant 0 : index
    %c0_3 = arith.constant 0 : index
    %5 = memref.load %arg2[%c0_2, %c0_3] : memref<3x4xf32, #tpu.memory_space<smem>>
    %6 = vector.broadcast %5 : f32 to vector<2x128xf32>
    %7 = arith.mulf %4, %6 : vector<2x128xf32>
    %c0_4 = arith.constant 0 : index
    %c1 = arith.constant 1 : index
    %8 = arith.index_cast %1 : i32 to index
    %c0_5 = arith.constant 0 : index
    %9 = vector.load %arg4[%c0_4, %c1, %8, %c0_5] : memref<1x4x2x128xf32, #tpu.memory_space<vmem>>, vector<1x1x2x128xf32>
    %10 = vector.shape_cast %9 : vector<1x1x2x128xf32> to vector<2x128xf32>
    %c0_6 = arith.constant 0 : index
    %c1_7 = arith.constant 1 : index
    %11 = memref.load %arg2[%c0_6, %c1_7] : memref<3x4xf32, #tpu.memory_space<smem>>
    %12 = vector.broadcast %11 : f32 to vector<2x128xf32>
    %13 = arith.mulf %10, %12 : vector<2x128xf32>
    %14 = arith.addf %7, %13 : vector<2x128xf32>
    %c0_8 = arith.constant 0 : index
    %c2 = arith.constant 2 : index
    %15 = arith.index_cast %1 : i32 to index
    %c0_9 = arith.constant 0 : index
    %16 = vector.load %arg4[%c0_8, %c2, %15, %c0_9] : memref<1x4x2x128xf32, #tpu.memory_space<vmem>>, vector<1x1x2x128xf32>
    %17 = vector.shape_cast %16 : vector<1x1x2x128xf32> to vector<2x128xf32>
    %c0_10 = arith.constant 0 : index
    %c2_11 = arith.constant 2 : index
    %18 = memref.load %arg2[%c0_10, %c2_11] : memref<3x4xf32, #tpu.memory_space<smem>>
    %19 = vector.broadcast %18 : f32 to vector<2x128xf32>
    %20 = arith.mulf %17, %19 : vector<2x128xf32>
    %21 = arith.addf %14, %20 : vector<2x128xf32>
    %c0_12 = arith.constant 0 : index
    %c3 = arith.constant 3 : index
    %22 = arith.index_cast %1 : i32 to index
    %c0_13 = arith.constant 0 : index
    %23 = vector.load %arg4[%c0_12, %c3, %22, %c0_13] : memref<1x4x2x128xf32, #tpu.memory_space<vmem>>, vector<1x1x2x128xf32>
    %24 = vector.shape_cast %23 : vector<1x1x2x128xf32> to vector<2x128xf32>
    %c0_14 = arith.constant 0 : index
    %c3_15 = arith.constant 3 : index
    %25 = memref.load %arg2[%c0_14, %c3_15] : memref<3x4xf32, #tpu.memory_space<smem>>
    %26 = vector.broadcast %25 : f32 to vector<2x128xf32>
    %27 = arith.mulf %24, %26 : vector<2x128xf32>
    %28 = arith.addf %21, %27 : vector<2x128xf32>
    %c0_16 = arith.constant 0 : index
    %29 = memref.load %arg3[%c0_16] : memref<3xf32, #tpu.memory_space<smem>>
    %30 = vector.broadcast %29 : f32 to vector<2x128xf32>
    %31 = arith.addf %28, %30 : vector<2x128xf32>
    %c0_17 = arith.constant 0 : index
    %c0_18 = arith.constant 0 : index
    %32 = arith.index_cast %1 : i32 to index
    %c0_19 = arith.constant 0 : index
    %33 = vector.load %arg5[%c0_17, %c0_18, %32, %c0_19] : memref<1x3x2x128xf32, #tpu.memory_space<vmem>>, vector<1x1x2x128xf32>
    %34 = vector.shape_cast %33 : vector<1x1x2x128xf32> to vector<2x128xf32>
    %35 = vector.shape_cast %31 : vector<2x128xf32> to vector<1x1x2x128xf32>
    tpu.vector_store %arg5[%c0_17, %c0_18, %32, %c0_19], %35 {strides = array<i32>} : memref<1x3x2x128xf32, #tpu.memory_space<vmem>>, vector<1x1x2x128xf32>,
    %c0_20 = arith.constant 0 : index
    %c0_21 = arith.constant 0 : index
    %36 = arith.index_cast %1 : i32 to index
    %c0_22 = arith.constant 0 : index
    %37 = vector.load %arg4[%c0_20, %c0_21, %36, %c0_22] : memref<1x4x2x128xf32, #tpu.memory_space<vmem>>, vector<1x1x2x128xf32>
    %38 = vector.shape_cast %37 : vector<1x1x2x128xf32> to vector<2x128xf32>
    %c1_23 = arith.constant 1 : index
    %c0_24 = arith.constant 0 : index
    %39 = memref.load %arg2[%c1_23, %c0_24] : memref<3x4xf32, #tpu.memory_space<smem>>
    %40 = vector.broadcast %39 : f32 to vector<2x128xf32>
    %41 = arith.mulf %38, %40 : vector<2x128xf32>
    %c0_25 = arith.constant 0 : index
    %c1_26 = arith.constant 1 : index
    %42 = arith.index_cast %1 : i32 to index
    %c0_27 = arith.constant 0 : index
    %43 = vector.load %arg4[%c0_25, %c1_26, %42, %c0_27] : memref<1x4x2x128xf32, #tpu.memory_space<vmem>>, vector<1x1x2x128xf32>
    %44 = vector.shape_cast %43 : vector<1x1x2x128xf32> to vector<2x128xf32>
    %c1_28 = arith.constant 1 : index
    %c1_29 = arith.constant 1 : index
    %45 = memref.load %arg2[%c1_28, %c1_29] : memref<3x4xf32, #tpu.memory_space<smem>>
    %46 = vector.broadcast %45 : f32 to vector<2x128xf32>
    %47 = arith.mulf %44, %46 : vector<2x128xf32>
    %48 = arith.addf %41, %47 : vector<2x128xf32>
    %c0_30 = arith.constant 0 : index
    %c2_31 = arith.constant 2 : index
    %49 = arith.index_cast %1 : i32 to index
    %c0_32 = arith.constant 0 : index
    %50 = vector.load %arg4[%c0_30, %c2_31, %49, %c0_32] : memref<1x4x2x128xf32, #tpu.memory_space<vmem>>, vector<1x1x2x128xf32>
    %51 = vector.shape_cast %50 : vector<1x1x2x128xf32> to vector<2x128xf32>
    %c1_33 = arith.constant 1 : index
    %c2_34 = arith.constant 2 : index
    %52 = memref.load %arg2[%c1_33, %c2_34] : memref<3x4xf32, #tpu.memory_space<smem>>
    %53 = vector.broadcast %52 : f32 to vector<2x128xf32>
    %54 = arith.mulf %51, %53 : vector<2x128xf32>
    %55 = arith.addf %48, %54 : vector<2x128xf32>
    %c0_35 = arith.constant 0 : index
    %c3_36 = arith.constant 3 : index
    %56 = arith.index_cast %1 : i32 to index
    %c0_37 = arith.constant 0 : index
    %57 = vector.load %arg4[%c0_35, %c3_36, %56, %c0_37] : memref<1x4x2x128xf32, #tpu.memory_space<vmem>>, vector<1x1x2x128xf32>
    %58 = vector.shape_cast %57 : vector<1x1x2x128xf32> to vector<2x128xf32>
    %c1_38 = arith.constant 1 : index
    %c3_39 = arith.constant 3 : index
    %59 = memref.load %arg2[%c1_38, %c3_39] : memref<3x4xf32, #tpu.memory_space<smem>>
    %60 = vector.broadcast %59 : f32 to vector<2x128xf32>
    %61 = arith.mulf %58, %60 : vector<2x128xf32>
    %62 = arith.addf %55, %61 : vector<2x128xf32>
    %c1_40 = arith.constant 1 : index
    %63 = memref.load %arg3[%c1_40] : memref<3xf32, #tpu.memory_space<smem>>
    %64 = vector.broadcast %63 : f32 to vector<2x128xf32>
    %65 = arith.addf %62, %64 : vector<2x128xf32>
    %c0_41 = arith.constant 0 : index
    %c1_42 = arith.constant 1 : index
    %66 = arith.index_cast %1 : i32 to index
    %c0_43 = arith.constant 0 : index
    %67 = vector.load %arg5[%c0_41, %c1_42, %66, %c0_43] : memref<1x3x2x128xf32, #tpu.memory_space<vmem>>, vector<1x1x2x128xf32>
    %68 = vector.shape_cast %67 : vector<1x1x2x128xf32> to vector<2x128xf32>
    %69 = vector.shape_cast %65 : vector<2x128xf32> to vector<1x1x2x128xf32>
    tpu.vector_store %arg5[%c0_41, %c1_42, %66, %c0_43], %69 {strides = array<i32>} : memref<1x3x2x128xf32, #tpu.memory_space<vmem>>, vector<1x1x2x128xf32>,
    %c0_44 = arith.constant 0 : index
    %c0_45 = arith.constant 0 : index
    %70 = arith.index_cast %1 : i32 to index
    %c0_46 = arith.constant 0 : index
    %71 = vector.load %arg4[%c0_44, %c0_45, %70, %c0_46] : memref<1x4x2x128xf32, #tpu.memory_space<vmem>>, vector<1x1x2x128xf32>
    %72 = vector.shape_cast %71 : vector<1x1x2x128xf32> to vector<2x128xf32>
    %c2_47 = arith.constant 2 : index
    %c0_48 = arith.constant 0 : index
    %73 = memref.load %arg2[%c2_47, %c0_48] : memref<3x4xf32, #tpu.memory_space<smem>>
    %74 = vector.broadcast %73 : f32 to vector<2x128xf32>
    %75 = arith.mulf %72, %74 : vector<2x128xf32>
    %c0_49 = arith.constant 0 : index
    %c1_50 = arith.constant 1 : index
    %76 = arith.index_cast %1 : i32 to index
    %c0_51 = arith.constant 0 : index
    %77 = vector.load %arg4[%c0_49, %c1_50, %76, %c0_51] : memref<1x4x2x128xf32, #tpu.memory_space<vmem>>, vector<1x1x2x128xf32>
    %78 = vector.shape_cast %77 : vector<1x1x2x128xf32> to vector<2x128xf32>
    %c2_52 = arith.constant 2 : index
    %c1_53 = arith.constant 1 : index
    %79 = memref.load %arg2[%c2_52, %c1_53] : memref<3x4xf32, #tpu.memory_space<smem>>
    %80 = vector.broadcast %79 : f32 to vector<2x128xf32>
    %81 = arith.mulf %78, %80 : vector<2x128xf32>
    %82 = arith.addf %75, %81 : vector<2x128xf32>
    %c0_54 = arith.constant 0 : index
    %c2_55 = arith.constant 2 : index
    %83 = arith.index_cast %1 : i32 to index
    %c0_56 = arith.constant 0 : index
    %84 = vector.load %arg4[%c0_54, %c2_55, %83, %c0_56] : memref<1x4x2x128xf32, #tpu.memory_space<vmem>>, vector<1x1x2x128xf32>
    %85 = vector.shape_cast %84 : vector<1x1x2x128xf32> to vector<2x128xf32>
    %c2_57 = arith.constant 2 : index
    %c2_58 = arith.constant 2 : index
    %86 = memref.load %arg2[%c2_57, %c2_58] : memref<3x4xf32, #tpu.memory_space<smem>>
    %87 = vector.broadcast %86 : f32 to vector<2x128xf32>
    %88 = arith.mulf %85, %87 : vector<2x128xf32>
    %89 = arith.addf %82, %88 : vector<2x128xf32>
    %c0_59 = arith.constant 0 : index
    %c3_60 = arith.constant 3 : index
    %90 = arith.index_cast %1 : i32 to index
    %c0_61 = arith.constant 0 : index
    %91 = vector.load %arg4[%c0_59, %c3_60, %90, %c0_61] : memref<1x4x2x128xf32, #tpu.memory_space<vmem>>, vector<1x1x2x128xf32>
    %92 = vector.shape_cast %91 : vector<1x1x2x128xf32> to vector<2x128xf32>
    %c2_62 = arith.constant 2 : index
    %c3_63 = arith.constant 3 : index
    %93 = memref.load %arg2[%c2_62, %c3_63] : memref<3x4xf32, #tpu.memory_space<smem>>
    %94 = vector.broadcast %93 : f32 to vector<2x128xf32>
    %95 = arith.mulf %92, %94 : vector<2x128xf32>
    %96 = arith.addf %89, %95 : vector<2x128xf32>
    %c2_64 = arith.constant 2 : index
    %97 = memref.load %arg3[%c2_64] : memref<3xf32, #tpu.memory_space<smem>>
    %98 = vector.broadcast %97 : f32 to vector<2x128xf32>
    %99 = arith.addf %96, %98 : vector<2x128xf32>
    %c0_65 = arith.constant 0 : index
    %c2_66 = arith.constant 2 : index
    %100 = arith.index_cast %1 : i32 to index
    %c0_67 = arith.constant 0 : index
    %101 = vector.load %arg5[%c0_65, %c2_66, %100, %c0_67] : memref<1x3x2x128xf32, #tpu.memory_space<vmem>>, vector<1x1x2x128xf32>
    %102 = vector.shape_cast %101 : vector<1x1x2x128xf32> to vector<2x128xf32>
    %103 = vector.shape_cast %99 : vector<2x128xf32> to vector<1x1x2x128xf32>
    tpu.vector_store %arg5[%c0_65, %c2_66, %100, %c0_67], %103 {strides = array<i32>} : memref<1x3x2x128xf32, #tpu.memory_space<vmem>>, vector<1x1x2x128xf32>,
    %c1_i32 = arith.constant 1 : i32
    return
  }
  func.func @transform_0(%arg0: i32, %arg1: i32) -> (i32, i32) {
    %c0_i32 = arith.constant 0 : i32
    %c0_i32_0 = arith.constant 0 : i32
    %c0_i32_1 = arith.constant 0 : i32
    return %c0_i32, %c0_i32_0 : i32, i32
  }
  func.func @transform_1(%arg0: i32, %arg1: i32) -> i32 {
    %c0_i32 = arith.constant 0 : i32
    %c0_i32_0 = arith.constant 0 : i32
    return %c0_i32 : i32
  }
  func.func @transform_2(%arg0: i32, %arg1: i32) -> (i32, i32, i32, i32) {
    %c0_i32 = arith.constant 0 : i32
    %c0_i32_0 = arith.constant 0 : i32
    %c0_i32_1 = arith.constant 0 : i32
    return %arg0, %c0_i32, %arg1, %c0_i32_0 : i32, i32, i32, i32
  }
  func.func @transform_3(%arg0: i32, %arg1: i32) -> (i32, i32, i32, i32) {
    %c0_i32 = arith.constant 0 : i32
    %c0_i32_0 = arith.constant 0 : i32
    %c0_i32_1 = arith.constant 0 : i32
    return %arg0, %c0_i32, %arg1, %c0_i32_0 : i32, i32, i32, i32
  }
}

</mosaic_0001>

<bundles_post_ra>
// kernel: out_conv.1
= control target key start
LH: loop header
LB: loop body
LE: loop exit
PB: predicated region body
PF: predicated region fallthrough
CT: control target
= control target key end

     0   :  { %8 = vsyncpa [#allocation3], 0  ;;  %s670_s0 = inlined_call_operand.vmem [shape: f32[3,4], index: 0, kind: input, shape index: {}]   ;;  %s671_s1 = inlined_call_operand.vmem [shape: f32[3], index: 1, kind: input, shape index: {}]   ;;  %s672_s2 = inlined_call_operand.vmem [shape: f32[2,4,2,128], index: 2, kind: input, shape index: {}]   ;;  %s673_s3 = inlined_call_operand.vmem [shape: f32[2,3,2,128], index: 3, kind: output, shape index: {}]  }
   0x1   :  { %9 = vsyncpa [#allocation5], 0  ;;  %s586_s12 = smov 0   ;;  %s588_s13 = smov 0  }
   0x2   :  { %s590_s14 = smov 0  }
   0x3 LB: > { %s417_s15 = sadd.s32 4294967295, %s562_s14   ;;  %s27_s16 = sadd.s32 1, %s558_s13  ;;  %s562_s14 = sphi %s590_s14, %s15_s14   ;;  %s558_s13 = sphi %s588_s13, %s676_s13   ;;  %s554_s12 = sphi %s586_s12, %s675_s12  }
   0x4   : > { %p29_p0 = scmp.ge.s32.totalorder %s27_s16, 2  ;;  %p419_p1 = scmp.ge.s32.totalorder %s562_s14, 1 }
   0x5   : > { %p130_p2 = scmp.lt.s32.totalorder %s562_s14, 3  ;;  %p607_p4 = scmp.eq.s32.totalorder %s417_s15, 0 }
   0x6   : > { %s678_s16 = smov (%p29_p0, %s27_s16), 0  ;;  %s142_s20 = sshll.u32 %s670_s0, 4  ;;  %s143_s20 = int_to_ptr.vmem [resolvable:$true] %s142_s20 }
   0x7   : > { %p131_p3 = pnand %p419_p1, %p130_p2  ;;  %s152_s23 = sshll.u32 %s671_s1, 4  ;;  %s153_s23 = int_to_ptr.vmem [resolvable:$true] %s152_s23 }
   0x8   : > { %s564_s24 = smov [#allocation2]   ;;  %s565_s25 = smov [#allocation4]  }
   0x9   : > { %p465_p5 = pneg %p131_p3 }
   0xa   : > { %176 = sbr.rel (%p131_p3) target bundleno = 50 (0x32), region = 32 }
   0xb   : > { %p466_p6 = pnand %p607_p4, %p465_p5 }
   0xd   : > { %468 = dma.vmem_to_smem (!%p466_p6), %s143_s20, 64, %s564_s24, [#allocation3]  }
   0xe   : > { %471 = dma.vmem_to_smem (!%p466_p6), %s153_s23, 16, %s565_s25, [#allocation5]  }
   0xf   : > { %545 = dma.done.wait (%p607_p4), [#allocation3], 64  }
  0x10   : > { %547 = vsyncadd (%p607_p4), [#allocation3], 4294967232 }
  0x11   : > { %549 = dma.done.wait (%p607_p4), [#allocation5], 16  }
  0x12   : > { %551 = vsyncadd (%p607_p4), [#allocation5], 4294967280 }
  0x13   : > { %188 = sfence }
  0x14   : > { %p213_p7 = scmp.lt.s32.totalorder %s554_s12, 1  ;;  %s230_s26 = sld [smem:[#allocation2]] }
  0x15   : > { %s430_s27 = sld [smem:[#allocation2 + $0x1]] }
  0x16   : > { %s680_s12 = smov (!%p213_p7, %s554_s12), 1  ;;  %s432_s28 = sld [smem:[#allocation2 + $0x2]] }
  0x17   : > { %s455_s29 = sshll.u32 %s680_s12, 3  ;;  %s434_s6 = sld [smem:[#allocation2 + $0x3]] }
  0x18   : > { %s635_s5 = scalar_lea.vmem %s672_s2, %s455_s29  ;;  %s254_s7 = sld [smem:[#allocation4]] }
  0x19   : > { %v229_v0 = vld [vmem:[%s635_s5] sm:$0x3]  ;;  %v429_v2 = vld [vmem:[%s635_s5 + $0x2] sm:$0x3]  ;;  %v431_v5 = vld [vmem:[%s635_s5 + $0x4] sm:$0x3] }
  0x1a   : > { %v231_v1 = vstv %s230_s26  ;;  %s435_s8 = sld [smem:[#allocation2 + $0x80]]  ;;  %v433_v8 = vld [vmem:[%s635_s5 + $0x6] sm:$0x3]  ;;  %s456_s11 = smul.u32 6, %s680_s12  ;;  %v258_v14 = vld [vmem:[%s635_s5] sm:$0x3] }
  0x1b   : > { %v232_v3 = vmul.f32 %v231_v1, %v229_v0  ;;  %v237_v4 = vstv %s430_s27  ;;  %s437_s9 = sld [smem:[#allocation2 + $0x81]]  ;;  %v436_v16 = vld [vmem:[%s635_s5 + $0x2] sm:$0x3]  ;;  %v438_v19 = vld [vmem:[%s635_s5 + $0x4] sm:$0x3] }
  0x1c   : > { %v238_v6 = vmul.f32 %v429_v2, %v237_v4  ;;  %v244_v7 = vstv %s432_s28  ;;  %s439_s10 = sld [smem:[#allocation2 + $0x82]]  ;;  %s650_s12 = scalar_lea.vmem %s673_s3, %s456_s11  ;;  %v440_v22 = vld [vmem:[%s635_s5 + $0x6] sm:$0x3]  ;;  %v282_v28 = vld [vmem:[%s635_s5] sm:$0x3] }
  0x1d   : > { %v245_v10 = vmul.f32 %v431_v5, %v244_v7  ;;  %v251_v11 = vstv %s434_s6  ;;  %s441_s15 = sld [smem:[#allocation2 + $0x83]]  ;;  %v445_v31 = vld [vmem:[%s635_s5 + $0x2] sm:$0x3]  ;;  %v447_v33 = vld [vmem:[%s635_s5 + $0x4] sm:$0x3] }
  0x1e   : > { %v239_v9 = vadd.f32 %v238_v6, %v232_v3  ;;  %v252_v13 = vmul.f32 %v433_v8, %v251_v11  ;;  %s643_s17 = sld [smem:[#allocation4 + $0x1]]  ;;  %v255_v15 = vstv %s254_s7  ;;  %v449_v37 = vld [vmem:[%s635_s5 + $0x6] sm:$0x3] }
  0x1f   : > { %s444_s18 = sld [smem:[#allocation2 + $0x100]] }
  0x20   : > { %v246_v12 = vadd.f32 %v245_v10, %v239_v9  ;;  %v260_v18 = vstv %s435_s8  ;;  %s446_s19 = sld [smem:[#allocation2 + $0x101]] }
  0x21   : > { %v261_v20 = vmul.f32 %v260_v18, %v258_v14  ;;  %v264_v21 = vstv %s437_s9  ;;  %s448_s22 = sld [smem:[#allocation2 + $0x102]] }
  0x22   : > { %v253_v17 = vadd.f32 %v252_v13, %v246_v12  ;;  %v265_v24 = vmul.f32 %v436_v16, %v264_v21  ;;  %v269_v25 = vstv %s439_s10  ;;  %s450_s23 = sld [smem:[#allocation2 + $0x103]] }
  0x23   : > { %v270_v26 = vmul.f32 %v438_v19, %v269_v25  ;;  %v274_v27 = vstv %s441_s15  ;;  %s451_s24 = sld [smem:[#allocation4 + $0x2]] }
  0x24   : > { %v256_v23 = vadd.f32 %v255_v15, %v253_v17  ;;  %v266_v29 = vadd.f32 %v265_v24, %v261_v20  ;;  %v275_v30 = vmul.f32 %v440_v22, %v274_v27  ;;  %v278_v38 = vstv %s643_s17 }
  0x25   : > { %v284_v32 = vstv %s444_s18 }
  0x26   : > { %257 = vst [vmem:[%s650_s12] sm:$0x3] %v256_v23  ;;  %v271_v34 = vadd.f32 %v270_v26, %v266_v29  ;;  %v285_v35 = vmul.f32 %v284_v32, %v282_v28  ;;  %v288_v36 = vstv %s446_s19 }
  0x27   : > { %v289_v39 = vmul.f32 %v445_v31, %v288_v36  ;;  %v293_v40 = vstv %s448_s22 }
  0x28   : > { %v276_v41 = vadd.f32 %v275_v30, %v271_v34  ;;  %v294_v42 = vmul.f32 %v447_v33, %v293_v40  ;;  %v298_v43 = vstv %s450_s23 }
  0x29   : > { %v290_v44 = vadd.f32 %v289_v39, %v285_v35  ;;  %v299_v45 = vmul.f32 %v449_v37, %v298_v43  ;;  %v302_v48 = vstv %s451_s24 }
  0x2a   : > { %v279_v46 = vadd.f32 %v278_v38, %v276_v41 }
  0x2b   : > { %v295_v47 = vadd.f32 %v294_v42, %v290_v44 }
  0x2c   : > { %443 = vst [vmem:[%s650_s12 + $0x2] sm:$0x3] %v279_v46 }
  0x2d   : > { %v300_v49 = vadd.f32 %v299_v45, %v295_v47 }
  0x2f   : > { %v303_v50 = vadd.f32 %v302_v48, %v300_v49 }
  0x31   : > { %452 = vst [vmem:[%s650_s12 + $0x4] sm:$0x3] %v303_v50 }
  0x32 PF: > { %s15_s14 = sadd.s32 1, %s562_s14   ;;  %s675_s12 = smov %s558_s13 }
  0x33   : > { %p12_p8 = scmp.ge.s32.totalorder %s15_s14, 4   ;;  %s676_s13 = smov %s678_s16 }
  0x35   :  { %14 = sbr.rel (!%p12_p8) target bundleno = 3 (0x3), region = 76 }
  0x3a   :  { %333 = vsyncpa [#allocation3], 1 }
  0x3b   :  { %335 = vsyncpa [#allocation3 + $0x1], 1 }
  0x3c   :  { %336 = vsyncpa [#allocation5], 1 }

</bundles_post_ra>
